<compile_context>
chip_gen: v7x
topology: tpu7x:2x2x1
jax: 0.10.0
libtpu: 0.0.40
codegen_flags: <defaults>
</compile_context>

<pallas_src>
import jax
import jax.numpy as jnp
from jax.experimental import pallas as pl
from jax.experimental.pallas import tpu as pltpu


def mlp2_kernel(x_ref, w1_ref, b1_ref, w2_ref, b2_ref, w3_ref, b3_ref, o_ref):
    # Activations stay f32; cast to bf16 only at the MXU inputs (weights are
    # already bf16); every dot accumulates in f32.
    x = x_ref[...]
    h1 = jnp.dot(x.astype(jnp.bfloat16), w1_ref[...],
                 preferred_element_type=jnp.float32)
    h1 = jnp.maximum(h1 + b1_ref[...], 0.0)

    h2 = jnp.dot(h1.astype(jnp.bfloat16), w2_ref[...],
                 preferred_element_type=jnp.float32)
    h2 = jnp.maximum(h2 + b2_ref[...], 0.0)

    logits = jnp.dot(h2.astype(jnp.bfloat16), w3_ref[...],
                     preferred_element_type=jnp.float32)
    logits = logits + b3_ref[...]          # padded lanes carry -1e30 bias (f32)

    # Numerically stable softmax over the (lane-dense, padded) class dim.
    m = jnp.max(logits, axis=-1, keepdims=True)
    e = jnp.exp(logits - m)                # exp(padded) == 0 → softmax unchanged
    denom = jnp.sum(e, axis=-1, keepdims=True)
    # Exact reciprocal: EUP has plenty of slack here, and it keeps softmax
    # rows summing to 1 at f32 precision (approx=True broke the tolerance).
    o_ref[...] = (e * pl.reciprocal(denom, approx=False)).astype(o_ref.dtype)


def _round_up(n, m):
    return ((n + m - 1) // m) * m


def prepare_params(w1, b1, w2, b2, w3, b3):
    """One-time weight preprocessing, hoisted out of the forward path.

    Weights go to bf16 (halves weight DMA bytes); fc3's weight is zero-padded
    to a lane-dense 128-wide output and its bias padded with -1e30 (kept in
    f32 — bf16 would overflow to -inf) so padded logits contribute exp()==0
    to the softmax denominator.  Biases stay f32 (v5e has no bf16 VPU).
    """
    num_classes = w3.shape[1]
    npad = _round_up(num_classes, 128)
    w1b = w1.astype(jnp.bfloat16)
    w2b = w2.astype(jnp.bfloat16)
    w3p = jnp.zeros((w3.shape[0], npad), jnp.bfloat16)
    w3p = w3p.at[:, :num_classes].set(w3.astype(jnp.bfloat16))
    b3p = jnp.full((1, npad), -1e30, jnp.float32)
    b3p = b3p.at[0, :num_classes].set(b3.astype(jnp.float32))
    b1r = b1.reshape(1, -1).astype(jnp.float32)
    b2r = b2.reshape(1, -1).astype(jnp.float32)
    return (w1b, b1r, w2b, b2r, w3p, b3p), num_classes


def mlp2_forward(x, prepared, num_classes, *, tm=512):
    """x: (B, D1, D2) with D1*D2 == C*H*W.  Returns (B, num_classes) probs.

    tm: batch tile (rows per grid step).  512 is a multiple of 256 (full MXU
    occupancy on v6e/v7x) and large enough to amortize per-step overhead;
    it is clamped for tiny batches so B << tm does no redundant work.
    """
    w1b, b1r, w2b, b2r, w3p, b3p = prepared
    B = x.shape[0]
    x2d = x.reshape(B, -1)
    if x2d.dtype not in (jnp.float32, jnp.bfloat16):
        x2d = x2d.astype(jnp.float32)   # pass bf16 from the producer to halve x DMA
    din = x2d.shape[1]
    npad = w3p.shape[1]

    # Tiny-batch clamp (sublane-aligned), then pad batch up to a tile multiple.
    tm_eff = min(tm, _round_up(B, 8))
    bp = _round_up(B, tm_eff)
    if bp != B:
        x2d = jnp.pad(x2d, ((0, bp - B), (0, 0)))

    resident = lambda a: pl.BlockSpec(a.shape, lambda i: (0, 0))

    # Raise v5e's 16 MiB scoped-VMEM default only if a huge tile needs it.
    weight_bytes = sum(int(a.size) * a.dtype.itemsize
                       for a in (w1b, b1r, w2b, b2r, w3p, b3p))
    tile_bytes = 2 * (tm_eff * din * x2d.dtype.itemsize + tm_eff * npad * 4)
    need = tile_bytes + 2 * weight_bytes
    cp_kwargs = {"dimension_semantics": ("parallel",)}   # megacore on v7x
    if need > 14 * (2 ** 20):
        cp_kwargs["vmem_limit_bytes"] = min(int(need * 1.25) + (2 << 20),
                                            100 * (2 ** 20))

    out = pl.pallas_call(
        mlp2_kernel,
        out_shape=jax.ShapeDtypeStruct((bp, npad), jnp.float32),
        grid=(bp // tm_eff,),
        in_specs=[
            pl.BlockSpec((tm_eff, din), lambda i: (i, 0)),   # streamed x tile
            resident(w1b), resident(b1r),                    # weights/biases stay
            resident(w2b), resident(b2r),                    # VMEM-resident
            resident(w3p), resident(b3p),
        ],
        out_specs=pl.BlockSpec((tm_eff, npad), lambda i: (i, 0)),
        compiler_params=pltpu.CompilerParams(**cp_kwargs),
    )(x2d, w1b, b1r, w2b, b2r, w3p, b3p)

    return out[:B, :num_classes]


def init_params(key, in_dim, num_classes):
    """PyTorch-nn.Linear-style init (uniform +/- 1/sqrt(fan_in)), weights
    stored as (in_features, out_features)."""
    dims = [(in_dim, 512), (512, 256), (256, num_classes)]
    params = []
    for (fan_in, fan_out) in dims:
        key, kw, kb = jax.random.split(key, 3)
        bound = 1.0 / jnp.sqrt(fan_in)
        w = jax.random.uniform(kw, (fan_in, fan_out), jnp.float32, -bound, bound)
        b = jax.random.uniform(kb, (fan_out,), jnp.float32, -bound, bound)
        params += [w, b]
    return params


if __name__ == "__main__":
    # config: image_C=1, image_H=16, image_W=16, num_classes=10
    B, H, W, C = 2, 16, 16, 1
    num_classes = 10
    in_dim = C * H * W

    key = jax.random.PRNGKey(0)
    key, kx = jax.random.split(key)
    x = jax.random.normal(kx, (B, H, W), jnp.float32)      # (B, D1, D2)

    w1, b1, w2, b2, w3, b3 = init_params(key, in_dim, num_classes)

    prepared, ncls = prepare_params(w1, b1, w2, b2, w3, b3)   # one-time prep
    out = mlp2_forward(x, prepared, ncls)
    out = jax.block_until_ready(out)

    assert out.shape == (B, num_classes)
    # exact softmax divide → rows sum to 1 at ~f32 precision
    assert jnp.allclose(jnp.sum(out, axis=-1), 1.0, atol=1e-3)

    # Reference mirroring the kernel's mixed precision (bf16 matmul inputs,
    # f32 accumulation / elementwise), exact softmax.
    x2d = x.reshape(B, -1)
    w1b_, w2b_, w3b_ = (w.astype(jnp.bfloat16) for w in (w1, w2, w3))
    h1 = jnp.maximum(jnp.dot(x2d.astype(jnp.bfloat16), w1b_,
                             preferred_element_type=jnp.float32) + b1, 0.0)
    h2 = jnp.maximum(jnp.dot(h1.astype(jnp.bfloat16), w2b_,
                             preferred_element_type=jnp.float32) + b2, 0.0)
    logits = jnp.dot(h2.astype(jnp.bfloat16), w3b_,
                     preferred_element_type=jnp.float32) + b3
    ref = jax.nn.softmax(logits, axis=-1)
    assert jnp.allclose(out, ref, atol=2e-3, rtol=2e-3)

    print("KERNEL_OK")
</pallas_src>

<mosaic_0001>
module attributes {stable_mosaic.version = 11 : i64} {
  func.func @mlp2_kernel(%arg0: i32, %arg1: memref<8x256xf32, #tpu.memory_space<vmem>>, %arg2: memref<256x512xbf16, #tpu.memory_space<vmem>>, %arg3: memref<1x512xf32, #tpu.memory_space<vmem>>, %arg4: memref<512x256xbf16, #tpu.memory_space<vmem>>, %arg5: memref<1x256xf32, #tpu.memory_space<vmem>>, %arg6: memref<256x128xbf16, #tpu.memory_space<vmem>>, %arg7: memref<1x128xf32, #tpu.memory_space<vmem>>, %arg8: memref<8x128xf32, #tpu.memory_space<vmem>>) attributes {dimension_semantics = [#tpu.dimension_semantics<parallel>], iteration_bounds = array<i64: 1>, scalar_prefetch = 0 : i64, scratch_operands = 0 : i64, tpu.core_type = #tpu.core_type<tc>, window_params = [{transform_indices = @transform_0, window_bounds = array<i64: 8, 256>}, {pipeline_mode = #tpu.pipeline_mode<synchronous>, transform_indices = @transform_1, window_bounds = array<i64: 256, 512>}, {pipeline_mode = #tpu.pipeline_mode<synchronous>, transform_indices = @transform_2, window_bounds = array<i64: 1, 512>}, {pipeline_mode = #tpu.pipeline_mode<synchronous>, transform_indices = @transform_3, window_bounds = array<i64: 512, 256>}, {pipeline_mode = #tpu.pipeline_mode<synchronous>, transform_indices = @transform_4, window_bounds = array<i64: 1, 256>}, {pipeline_mode = #tpu.pipeline_mode<synchronous>, transform_indices = @transform_5, window_bounds = array<i64: 256, 128>}, {pipeline_mode = #tpu.pipeline_mode<synchronous>, transform_indices = @transform_6, window_bounds = array<i64: 1, 128>}, {transform_indices = @transform_7, window_bounds = array<i64: 8, 128>}]} {
    %c0 = arith.constant 0 : index
    %c0_0 = arith.constant 0 : index
    %0 = vector.load %arg1[%c0, %c0_0] : memref<8x256xf32, #tpu.memory_space<vmem>>, vector<8x256xf32>
    %1 = arith.truncf %0 : vector<8x256xf32> to vector<8x256xbf16>
    %c0_1 = arith.constant 0 : index
    %c0_2 = arith.constant 0 : index
    %2 = vector.load %arg2[%c0_1, %c0_2] : memref<256x512xbf16, #tpu.memory_space<vmem>>, vector<256x512xbf16>
    %cst = arith.constant dense<0.000000e+00> : vector<8x512xf32>
    %3 = tpu.matmul %1, %2, %cst {dimension_numbers = #tpu.dot_dimension_numbers<[1], [0], [0], [1], [0, 0, 1, 1], [], []>} : vector<8x256xbf16>, vector<256x512xbf16>, vector<8x512xf32> -> vector<8x512xf32>
    %c0_3 = arith.constant 0 : index
    %c0_4 = arith.constant 0 : index
    %4 = vector.load %arg3[%c0_3, %c0_4] : memref<1x512xf32, #tpu.memory_space<vmem>>, vector<1x512xf32>
    %5 = vector.broadcast %4 : vector<1x512xf32> to vector<8x512xf32>
    %6 = arith.addf %3, %5 : vector<8x512xf32>
    %cst_5 = arith.constant 0.000000e+00 : f32
    %7 = vector.broadcast %cst_5 : f32 to vector<8x512xf32>
    %8 = arith.maximumf %6, %7 : vector<8x512xf32>
    %9 = arith.truncf %8 : vector<8x512xf32> to vector<8x512xbf16>
    %c0_6 = arith.constant 0 : index
    %c0_7 = arith.constant 0 : index
    %10 = vector.load %arg4[%c0_6, %c0_7] : memref<512x256xbf16, #tpu.memory_space<vmem>>, vector<512x256xbf16>
    %cst_8 = arith.constant dense<0.000000e+00> : vector<8x256xf32>
    %11 = tpu.matmul %9, %10, %cst_8 {dimension_numbers = #tpu.dot_dimension_numbers<[1], [0], [0], [1], [0, 0, 1, 1], [], []>} : vector<8x512xbf16>, vector<512x256xbf16>, vector<8x256xf32> -> vector<8x256xf32>
    %c0_9 = arith.constant 0 : index
    %c0_10 = arith.constant 0 : index
    %12 = vector.load %arg5[%c0_9, %c0_10] : memref<1x256xf32, #tpu.memory_space<vmem>>, vector<1x256xf32>
    %13 = vector.broadcast %12 : vector<1x256xf32> to vector<8x256xf32>
    %14 = arith.addf %11, %13 : vector<8x256xf32>
    %cst_11 = arith.constant 0.000000e+00 : f32
    %15 = vector.broadcast %cst_11 : f32 to vector<8x256xf32>
    %16 = arith.maximumf %14, %15 : vector<8x256xf32>
    %17 = arith.truncf %16 : vector<8x256xf32> to vector<8x256xbf16>
    %c0_12 = arith.constant 0 : index
    %c0_13 = arith.constant 0 : index
    %18 = vector.load %arg6[%c0_12, %c0_13] : memref<256x128xbf16, #tpu.memory_space<vmem>>, vector<256x128xbf16>
    %cst_14 = arith.constant dense<0.000000e+00> : vector<8x128xf32>
    %19 = tpu.matmul %17, %18, %cst_14 {dimension_numbers = #tpu.dot_dimension_numbers<[1], [0], [0], [1], [0, 0, 1, 1], [], []>} : vector<8x256xbf16>, vector<256x128xbf16>, vector<8x128xf32> -> vector<8x128xf32>
    %c0_15 = arith.constant 0 : index
    %c0_16 = arith.constant 0 : index
    %20 = vector.load %arg7[%c0_15, %c0_16] : memref<1x128xf32, #tpu.memory_space<vmem>>, vector<1x128xf32>
    %21 = vector.broadcast %20 : vector<1x128xf32> to vector<8x128xf32>
    %22 = arith.addf %19, %21 : vector<8x128xf32>
    %cst_17 = arith.constant dense<0xFF800000> : vector<8xf32>
    %23 = vector.multi_reduction <maximumf>, %22, %cst_17 [1] : vector<8x128xf32> to vector<8xf32>
    %24 = vector.shape_cast %23 : vector<8xf32> to vector<8x1xf32>
    %25 = vector.broadcast %24 : vector<8x1xf32> to vector<8x128xf32>
    %26 = arith.subf %22, %25 : vector<8x128xf32>
    %27 = math.exp %26 : vector<8x128xf32>
    %cst_18 = arith.constant dense<0.000000e+00> : vector<8xf32>
    %28 = vector.multi_reduction <add>, %27, %cst_18 [1] : vector<8x128xf32> to vector<8xf32>
    %29 = vector.shape_cast %28 : vector<8xf32> to vector<8x1xf32>
    %30 = tpu.reciprocal %29 : vector<8x1xf32> -> vector<8x1xf32>
    %31 = vector.broadcast %30 : vector<8x1xf32> to vector<8x128xf32>
    %32 = arith.mulf %27, %31 : vector<8x128xf32>
    %c0_19 = arith.constant 0 : index
    %c0_20 = arith.constant 0 : index
    %33 = vector.load %arg8[%c0_19, %c0_20] : memref<8x128xf32, #tpu.memory_space<vmem>>, vector<8x128xf32>
    tpu.vector_store %arg8[%c0_19, %c0_20], %32 {strides = array<i32>} : memref<8x128xf32, #tpu.memory_space<vmem>>, vector<8x128xf32>,
    return
  }
  func.func @transform_0(%arg0: i32) -> (i32, i32) {
    %c0_i32 = arith.constant 0 : i32
    %c0_i32_0 = arith.constant 0 : i32
    return %arg0, %c0_i32 : i32, i32
  }
  func.func @transform_1(%arg0: i32) -> (i32, i32) {
    %c0_i32 = arith.constant 0 : i32
    %c0_i32_0 = arith.constant 0 : i32
    %c0_i32_1 = arith.constant 0 : i32
    return %c0_i32, %c0_i32_0 : i32, i32
  }
  func.func @transform_2(%arg0: i32) -> (i32, i32) {
    %c0_i32 = arith.constant 0 : i32
    %c0_i32_0 = arith.constant 0 : i32
    %c0_i32_1 = arith.constant 0 : i32
    return %c0_i32, %c0_i32_0 : i32, i32
  }
  func.func @transform_3(%arg0: i32) -> (i32, i32) {
    %c0_i32 = arith.constant 0 : i32
    %c0_i32_0 = arith.constant 0 : i32
    %c0_i32_1 = arith.constant 0 : i32
    return %c0_i32, %c0_i32_0 : i32, i32
  }
  func.func @transform_4(%arg0: i32) -> (i32, i32) {
    %c0_i32 = arith.constant 0 : i32
    %c0_i32_0 = arith.constant 0 : i32
    %c0_i32_1 = arith.constant 0 : i32
    return %c0_i32, %c0_i32_0 : i32, i32
  }
  func.func @transform_5(%arg0: i32) -> (i32, i32) {
    %c0_i32 = arith.constant 0 : i32
    %c0_i32_0 = arith.constant 0 : i32
    %c0_i32_1 = arith.constant 0 : i32
    return %c0_i32, %c0_i32_0 : i32, i32
  }
  func.func @transform_6(%arg0: i32) -> (i32, i32) {
    %c0_i32 = arith.constant 0 : i32
    %c0_i32_0 = arith.constant 0 : i32
    %c0_i32_1 = arith.constant 0 : i32
    return %c0_i32, %c0_i32_0 : i32, i32
  }
  func.func @transform_7(%arg0: i32) -> (i32, i32) {
    %c0_i32 = arith.constant 0 : i32
    %c0_i32_0 = arith.constant 0 : i32
    return %arg0, %c0_i32 : i32, i32
  }
}

</mosaic_0001>

<bundles_post_ra>
// kernel: tpu_custom_call.1
= control target key start
LH: loop header
LB: loop body
LE: loop exit
PB: predicated region body
PF: predicated region fallthrough
CT: control target
= control target key end

     0   :  { %12 = vsyncpa [#allocation3], 0  ;;  %s1927_s0 = inlined_call_operand.hbm [shape: f32[8,256], index: 0, kind: input, shape index: {}]   ;;  %s1928_s1 = inlined_call_operand.hbm [shape: bf16[256,512], index: 1, kind: input, shape index: {}]   ;;  %s1929_s2 = inlined_call_operand.vmem [shape: f32[1,512], index: 2, kind: input, shape index: {}]   ;;  %s1930_s3 = inlined_call_operand.hbm [shape: bf16[512,256], index: 3, kind: input, shape index: {}]   ;;  %s1931_s4 = inlined_call_operand.vmem [shape: f32[1,256], index: 4, kind: input, shape index: {}]   ;;  %s1932_s5 = inlined_call_operand.hbm [shape: bf16[256,128], index: 5, kind: input, shape index: {}]   ;;  %s1933_s6 = inlined_call_operand.vmem [shape: f32[1,128], index: 6, kind: input, shape index: {}]   ;;  %s1934_s7 = inlined_call_operand.hbm [shape: f32[8,128], index: 7, kind: output, shape index: {}]  }
   0x1   :  { %13 = vsyncpa [#allocation6], 0 }
   0x2   :  { %14 = vsyncpa [#allocation9], 0 }
   0x3   :  { %15 = vsyncpa [#allocation4], 0  ;;  %s1779_s24 = smov [#allocation5]   ;;  %s1661_s28 = scalar_lea.hbm %s1928_s1, 8192 }
   0x4   :  { %s31_s25 = sshll.u32 %s1779_s24, 4  ;;  %p1662_p0 = scmp.ne.s32.totalorder %s1928_s1, %s1661_s28  ;;  %s32_s25 = int_to_ptr.vmem [resolvable:$true] %s31_s25 }
   0x5   :  { %p1665_p1 = scmp.lt.u32.totalorder %s1661_s28, %s1928_s1 }
   0x7   :  { %p1667_p2 = pnand %p1665_p1, %p1662_p0 }
   0x9   :  { %1670 = shalt.err (!%p1667_p2)
}
   0xa   :  { %s1671_s10 = scalar_lea.vmem %s32_s25, 8192  ;;  %p1676_p4 = scmp.lt.s32.totalorder %s32_s25, %s32_s25 }
   0xb   :  { %p1672_p3 = scmp.ne.s32.totalorder %s32_s25, %s1671_s10  ;;  %p1677_p5 = scmp.lt.s32.totalorder %s1671_s10, %s1671_s10 }
   0xd   :  { %p1678_p6 = por %p1677_p5, %p1676_p4 }
   0xf   :  { %p1679_p7 = pnand %p1678_p6, %p1672_p3 }
  0x11   :  { %1682 = shalt.err (!%p1679_p7)
}
  0x12   :  { %s1780_s11 = smov 256   ;;  %s1781_s12 = smov 16  }
  0x13   :  { %37 = dma.hbm_to_vmem [thread:$0]  %s1928_s1, 8192, %s32_s25, [#allocation6], %s1780_s11, %s1780_s11, %s1781_s12  }
  0x14   :  { %s1782_s15 = smov [#allocation2]   ;;  %s1783_s17 = smov [#allocation7]  }
  0x15   :  { %s22_s16 = sshll.u32 %s1782_s15, 4  ;;  %s45_s18 = sshll.u32 %s1783_s17, 4  ;;  %s23_s16 = int_to_ptr.vmem [resolvable:$true] %s22_s16  ;;  %s46_s18 = int_to_ptr.vmem [resolvable:$true] %s45_s18 }
  0x16   :  { %s1683_s21 = scalar_lea.hbm %s1927_s0, 256 }
  0x17   :  { %p1684_p8 = scmp.ne.s32.totalorder %s1927_s0, %s1683_s21  ;;  %p1687_p9 = scmp.lt.u32.totalorder %s1683_s21, %s1927_s0 }
  0x19   :  { %p1689_p10 = pnand %p1687_p9, %p1684_p8 }
  0x1b   :  { %1692 = shalt.err (!%p1689_p10)
}
  0x1c   :  { %s1693_s1 = scalar_lea.vmem %s23_s16, 256  ;;  %p1698_p12 = scmp.lt.s32.totalorder %s23_s16, %s23_s16 }
  0x1d   :  { %p1694_p11 = scmp.ne.s32.totalorder %s23_s16, %s1693_s1  ;;  %p1699_p13 = scmp.lt.s32.totalorder %s1693_s1, %s1693_s1 }
  0x1f   :  { %p1700_p0 = por %p1699_p13, %p1698_p12 }
  0x21   :  { %p1701_p1 = pnand %p1700_p0, %p1694_p11 }
  0x23   :  { %1704 = shalt.err (!%p1701_p1)
}
  0x24   :  { %25 = dma.hbm_to_vmem [thread:$0]  %s1927_s0, 256, %s23_s16, [#allocation3]  }
  0x25   :  { %s1705_s30 = scalar_lea.hbm %s1930_s3, 8192 }
  0x26   :  { %p1706_p2 = scmp.ne.s32.totalorder %s1930_s3, %s1705_s30  ;;  %p1709_p3 = scmp.lt.u32.totalorder %s1705_s30, %s1930_s3 }
  0x28   :  { %p1711_p4 = pnand %p1709_p3, %p1706_p2 }
  0x2a   :  { %1714 = shalt.err (!%p1711_p4)
}
  0x2b   :  { %s1715_s12 = scalar_lea.vmem %s46_s18, 8192  ;;  %p1720_p6 = scmp.lt.s32.totalorder %s46_s18, %s46_s18 }
  0x2c   :  { %p1716_p5 = scmp.ne.s32.totalorder %s46_s18, %s1715_s12  ;;  %p1721_p7 = scmp.lt.s32.totalorder %s1715_s12, %s1715_s12 }
  0x2e   :  { %p1722_p8 = por %p1721_p7, %p1720_p6 }
  0x30   :  { %p1723_p9 = pnand %p1722_p8, %p1716_p5 }
  0x32   :  { %1726 = shalt.err (!%p1723_p9)
}
  0x33   :  { %s1784_s0 = smov 128   ;;  %s1785_s13 = smov 8  }
  0x34   :  { %51 = dma.hbm_to_vmem [thread:$0]  %s1930_s3, 8192, %s46_s18, [#allocation6], %s1784_s0, %s1784_s0, %s1785_s13  }
  0x35   :  { %s1786_s16 = smov [#allocation8]   ;;  %s1727_s21 = scalar_lea.hbm %s1932_s5, 2048 }
  0x36   :  { %s59_s17 = sshll.u32 %s1786_s16, 4  ;;  %p1728_p10 = scmp.ne.s32.totalorder %s1932_s5, %s1727_s21  ;;  %s60_s17 = int_to_ptr.vmem [resolvable:$true] %s59_s17 }
  0x37   :  { %p1731_p11 = scmp.lt.u32.totalorder %s1727_s21, %s1932_s5 }
  0x39   :  { %p1733_p12 = pnand %p1731_p11, %p1728_p10 }
  0x3b   :  { %1736 = shalt.err (!%p1733_p12)
}
  0x3c   :  { %s1737_s1 = scalar_lea.vmem %s60_s17, 2048  ;;  %p1742_p0 = scmp.lt.s32.totalorder %s60_s17, %s60_s17 }
  0x3d   :  { %p1738_p13 = scmp.ne.s32.totalorder %s60_s17, %s1737_s1  ;;  %p1743_p1 = scmp.lt.s32.totalorder %s1737_s1, %s1737_s1 }
  0x3f   :  { %p1744_p2 = por %p1743_p1, %p1742_p0 }
  0x41   :  { %p1745_p3 = pnand %p1744_p2, %p1738_p13 }
  0x43   :  { %1748 = shalt.err (!%p1745_p3)
}
  0x44   :  { %s1787_s3 = smov 64   ;;  %s1788_s18 = smov 4  }
  0x45   :  { %65 = dma.hbm_to_vmem [thread:$0]  %s1932_s5, 2048, %s60_s17, [#allocation9], %s1787_s3, %s1787_s3, %s1788_s18  }
  0x46   :  { %1771 = dma.done.wait [#allocation3], 256  }
  0x47   :  { %1772 = vsyncadd [#allocation3], 4294967040 }
  0x48   :  { %1773 = dma.done.wait [#allocation6], 16384  }
  0x49   :  { %1774 = vsyncadd [#allocation6], 4294950912 }
  0x4a   :  { %1775 = dma.done.wait [#allocation9], 2048  }
  0x4b   :  { %1776 = vsyncadd [#allocation9], 4294965248  ;;  %v1449_v0 = vld [vmem:[#allocation5 + $0x4] ss:$16 sps:$4 sm:$0xff]   ;;  %v1451_v1 = vld [vmem:[#allocation5] ss:$16 sps:$4 sm:$0xff]  }
  0x4c   :  { %491 = vmatprep.subr.bf16.mxu1 %v1449_v0  ;;  %v1452_v2 = vld [vmem:[#allocation5 + $0x24] ss:$16 sps:$4 sm:$0xff]   ;;  %v1454_v3 = vld [vmem:[#allocation5 + $0x20] ss:$16 sps:$4 sm:$0xff]   ;;  %v82_v13 = vld [vmem:[#allocation2 + $0x8] sm:$0xff]  ;;  %s1789_s8 = smov [#allocation10]  }
  0x4d   :  { %492 = vmatpush1.bf16.msra.mxu1 %v1451_v1  ;;  %v1455_v4 = vld [vmem:[#allocation5 + $0x44] ss:$16 sps:$4 sm:$0xff]   ;;  %v1457_v5 = vld [vmem:[#allocation5 + $0x40] ss:$16 sps:$4 sm:$0xff]   ;;  %v1878_v14 = vpack.c.bf16 %v82_v13, %v82_v13  ;;  %v1499_v45 = vld [vmem:[#allocation5 + $0xc] ss:$16 sps:$4 sm:$0xff]  }
  0x4e   :  { %493 = vmatprep.subr.bf16.mxu1 %v1452_v2  ;;  %v1458_v6 = vld [vmem:[#allocation5 + $0x64] ss:$16 sps:$4 sm:$0xff]   ;;  %v1460_v7 = vld [vmem:[#allocation5 + $0x60] ss:$16 sps:$4 sm:$0xff]   ;;  %v1497_v47 = vld [vmem:[#allocation5 + $0x8] ss:$16 sps:$4 sm:$0xff]  }
  0x4f   :  { %v1461_v8 = vld [vmem:[#allocation5 + $0x84] ss:$16 sps:$4 sm:$0xff]   ;;  %v1463_v9 = vld [vmem:[#allocation5 + $0x80] ss:$16 sps:$4 sm:$0xff]   ;;  %523 = vmatprep.mubr.bf16.mxu1 %v1878_v14  ;;  %v1502_v49 = vld [vmem:[#allocation5 + $0x2c] ss:$16 sps:$4 sm:$0xff]  }
  0x50   :  { %v1464_v10 = vld [vmem:[#allocation5 + $0xa4] ss:$16 sps:$4 sm:$0xff]   ;;  %v1466_v11 = vld [vmem:[#allocation5 + $0xa0] ss:$16 sps:$4 sm:$0xff]   ;;  %v1500_v52 = vld [vmem:[#allocation5 + $0x28] ss:$16 sps:$4 sm:$0xff]  }
  0x51   :  { %494 = vmatpush1.bf16.msra.mxu1 %v1454_v3  ;;  %v1467_v12 = vld [vmem:[#allocation5 + $0xc4] ss:$16 sps:$4 sm:$0xff]   ;;  %v1469_v15 = vld [vmem:[#allocation5 + $0xc0] ss:$16 sps:$4 sm:$0xff]   ;;  %v1505_v53 = vld [vmem:[#allocation5 + $0x4c] ss:$16 sps:$4 sm:$0xff]  }
  0x52   :  { %495 = vmatprep.subr.bf16.mxu1 %v1455_v4  ;;  %v1470_v16 = vld [vmem:[#allocation5 + $0xe4] ss:$16 sps:$4 sm:$0xff]   ;;  %v1472_v17 = vld [vmem:[#allocation5 + $0xe0] ss:$16 sps:$4 sm:$0xff]   ;;  %v1503_v56 = vld [vmem:[#allocation5 + $0x48] ss:$16 sps:$4 sm:$0xff]  }
  0x53   :  { %v1473_v18 = vld [vmem:[#allocation5 + $0x104] ss:$16 sps:$4 sm:$0xff]   ;;  %v1475_v19 = vld [vmem:[#allocation5 + $0x100] ss:$16 sps:$4 sm:$0xff]   ;;  %v1508_v57 = vld [vmem:[#allocation5 + $0x6c] ss:$16 sps:$4 sm:$0xff]  }
  0x54   :  { %v1476_v20 = vld [vmem:[#allocation5 + $0x124] ss:$16 sps:$4 sm:$0xff]   ;;  %v1478_v21 = vld [vmem:[#allocation5 + $0x120] ss:$16 sps:$4 sm:$0xff]   ;;  %v1506_v60 = vld [vmem:[#allocation5 + $0x68] ss:$16 sps:$4 sm:$0xff]  }
  0x55   :  { %496 = vmatpush1.bf16.msra.mxu1 %v1457_v5  ;;  %v1479_v22 = vld [vmem:[#allocation5 + $0x144] ss:$16 sps:$4 sm:$0xff]   ;;  %v1481_v23 = vld [vmem:[#allocation5 + $0x140] ss:$16 sps:$4 sm:$0xff]   ;;  %v1511_v61 = vld [vmem:[#allocation5 + $0x8c] ss:$16 sps:$4 sm:$0xff]  }
  0x56   :  { %497 = vmatprep.subr.bf16.mxu1 %v1458_v6  ;;  %v1482_v24 = vld [vmem:[#allocation5 + $0x164] ss:$16 sps:$4 sm:$0xff]   ;;  %v1484_v25 = vld [vmem:[#allocation5 + $0x160] ss:$16 sps:$4 sm:$0xff]   ;;  %v1509_v0 = vld [vmem:[#allocation5 + $0x88] ss:$16 sps:$4 sm:$0xff]  }
  0x57   :  { %v1485_v26 = vld [vmem:[#allocation5 + $0x184] ss:$16 sps:$4 sm:$0xff]   ;;  %v1547_v28 = vld [vmem:[#allocation7] ss:$8 sps:$4 sm:$0xff]   ;;  %v1550_v31 = vld [vmem:[#allocation7 + $0x10] ss:$8 sps:$4 sm:$0xff]  }
  0x58   :  { %v1545_v27 = vld [vmem:[#allocation7 + $0x4] ss:$8 sps:$4 sm:$0xff]   ;;  %v1548_v29 = vld [vmem:[#allocation7 + $0x14] ss:$8 sps:$4 sm:$0xff]   ;;  %v1487_v30 = vld [vmem:[#allocation5 + $0x180] ss:$16 sps:$4 sm:$0xff]  }
  0x59   :  { %498 = vmatpush1.bf16.msra.mxu1 %v1460_v7  ;;  %977 = vmatprep.subr.bf16.mxu0 %v1545_v27  ;;  %v1488_v32 = vld [vmem:[#allocation5 + $0x1a4] ss:$16 sps:$4 sm:$0xff]   ;;  %v1490_v34 = vld [vmem:[#allocation5 + $0x1a0] ss:$16 sps:$4 sm:$0xff]   ;;  %v1514_v1 = vld [vmem:[#allocation5 + $0xac] ss:$16 sps:$4 sm:$0xff]  }
  0x5a   :  { %499 = vmatprep.subr.bf16.mxu1 %v1461_v8  ;;  %978 = vmatpush1.bf16.msra.mxu0 %v1547_v28  ;;  %v1551_v33 = vld [vmem:[#allocation7 + $0x24] ss:$8 sps:$4 sm:$0xff]   ;;  %v1553_v35 = vld [vmem:[#allocation7 + $0x20] ss:$8 sps:$4 sm:$0xff]   ;;  %v1554_v37 = vld [vmem:[#allocation7 + $0x34] ss:$8 sps:$4 sm:$0xff]  }
  0x5b   :  { %979 = vmatprep.subr.bf16.mxu0 %v1548_v29  ;;  %v1491_v36 = vld [vmem:[#allocation5 + $0x1c4] ss:$16 sps:$4 sm:$0xff]   ;;  %v1493_v38 = vld [vmem:[#allocation5 + $0x1c0] ss:$16 sps:$4 sm:$0xff]   ;;  %v1512_v4 = vld [vmem:[#allocation5 + $0xa8] ss:$16 sps:$4 sm:$0xff]  }
  0x5c   :  { %v1556_v39 = vld [vmem:[#allocation7 + $0x30] ss:$8 sps:$4 sm:$0xff]   ;;  %v1494_v40 = vld [vmem:[#allocation5 + $0x1e4] ss:$16 sps:$4 sm:$0xff]   ;;  %v1559_v44 = vld [vmem:[#allocation7 + $0x40] ss:$8 sps:$4 sm:$0xff]  }
  0x5d   :  { %500 = vmatpush1.bf16.msra.mxu1 %v1463_v9  ;;  %v1557_v41 = vld [vmem:[#allocation7 + $0x44] ss:$8 sps:$4 sm:$0xff]   ;;  %v1496_v42 = vld [vmem:[#allocation5 + $0x1e0] ss:$16 sps:$4 sm:$0xff]   ;;  %v1560_v46 = vld [vmem:[#allocation7 + $0x54] ss:$8 sps:$4 sm:$0xff]  }
  0x5e   :  { %501 = vmatprep.subr.bf16.mxu1 %v1464_v10  ;;  %980 = vmatpush1.bf16.msra.mxu0 %v1550_v31  ;;  %v81_v43 = vld [vmem:[#allocation2] sm:$0xff]  ;;  %v1563_v51 = vld [vmem:[#allocation7 + $0x64] ss:$8 sps:$4 sm:$0xff]   ;;  %v1565_v54 = vld [vmem:[#allocation7 + $0x60] ss:$8 sps:$4 sm:$0xff]   ;;  %s1254_s9 = sshll.u32 %s1789_s8, 4  ;;  %s1255_s9 = int_to_ptr.vmem [resolvable:$true] %s1254_s9 }
  0x5f   :  { %981 = vmatprep.subr.bf16.mxu0 %v1551_v33  ;;  %v1881_v48 = vpack.c.bf16 %v81_v43, %v81_v43  ;;  %v1562_v50 = vld [vmem:[#allocation7 + $0x50] ss:$8 sps:$4 sm:$0xff]   ;;  %v1566_v55 = vld [vmem:[#allocation7 + $0x74] ss:$8 sps:$4 sm:$0xff]   ;;  %v1569_v59 = vld [vmem:[#allocation7 + $0x84] ss:$8 sps:$4 sm:$0xff]   ;;  %p1754_p5 = scmp.lt.s32.totalorder %s1255_s9, %s1255_s9 }
  0x60   :  { %v1568_v58 = vld [vmem:[#allocation7 + $0x70] ss:$8 sps:$4 sm:$0xff]   ;;  %v1571_v62 = vld [vmem:[#allocation7 + $0x80] ss:$8 sps:$4 sm:$0xff]   ;;  %v1572_v63 = vld [vmem:[#allocation7 + $0x94] ss:$8 sps:$4 sm:$0xff]  }
  0x61   :  { %502 = vmatpush1.bf16.msra.mxu1 %v1466_v11  ;;  %v1574_v2 = vld [vmem:[#allocation7 + $0x90] ss:$8 sps:$4 sm:$0xff]   ;;  %v1575_v3 = vld [vmem:[#allocation7 + $0xa4] ss:$8 sps:$4 sm:$0xff]   ;;  %v1577_v6 = vld [vmem:[#allocation7 + $0xa0] ss:$8 sps:$4 sm:$0xff]  }
  0x62   :  { %503 = vmatprep.subr.bf16.mxu1 %v1467_v12  ;;  %982 = vmatpush1.bf16.msra.mxu0 %v1553_v35  ;;  %v1517_v5 = vld [vmem:[#allocation5 + $0xcc] ss:$16 sps:$4 sm:$0xff]   ;;  %v1515_v8 = vld [vmem:[#allocation5 + $0xc8] ss:$16 sps:$4 sm:$0xff]  }
  0x63   :  { %983 = vmatprep.subr.bf16.mxu0 %v1554_v37  ;;  %v1578_v7 = vld [vmem:[#allocation7 + $0xb4] ss:$8 sps:$4 sm:$0xff]   ;;  %v1580_v10 = vld [vmem:[#allocation7 + $0xb0] ss:$8 sps:$4 sm:$0xff]   ;;  %v1581_v11 = vld [vmem:[#allocation7 + $0xc4] ss:$8 sps:$4 sm:$0xff]  }
  0x64   :  { %v1520_v9 = vld [vmem:[#allocation5 + $0xec] ss:$16 sps:$4 sm:$0xff]   ;;  %v1518_v12 = vld [vmem:[#allocation5 + $0xe8] ss:$16 sps:$4 sm:$0xff]   ;;  %v1641_v37 = vld [vmem:[#allocation8 + $0x40] sm:$0xff]  }
  0x65   :  { %504 = vmatpush1.bf16.msra.mxu1 %v1469_v15  ;;  %v1523_v13 = vld [vmem:[#allocation5 + $0x10c] ss:$16 sps:$4 sm:$0xff]   ;;  %v1536_v27 = vld [vmem:[#allocation5 + $0x1a8] ss:$16 sps:$4 sm:$0xff]  }
  0x66   :  { %505 = vmatprep.subr.bf16.mxu1 %v1470_v16  ;;  %984 = vmatpush1.bf16.msra.mxu0 %v1556_v39  ;;  %v1584_v15 = vld [vmem:[#allocation7 + $0xd4] ss:$8 sps:$4 sm:$0xff]   ;;  %v1521_v16 = vld [vmem:[#allocation5 + $0x108] ss:$16 sps:$4 sm:$0xff]  }
  0x67   :  { %985 = vmatprep.subr.bf16.mxu0 %v1557_v41  ;;  %v1541_v28 = vld [vmem:[#allocation5 + $0x1cc] ss:$16 sps:$4 sm:$0xff]   ;;  %v1539_v29 = vld [vmem:[#allocation5 + $0x1c8] ss:$16 sps:$4 sm:$0xff]   ;;  %v1645_v41 = vld [vmem:[#allocation8 + $0x50] sm:$0xff]  }
  0x68   :  { %v1542_v31 = vld [vmem:[#allocation5 + $0x1e8] ss:$16 sps:$4 sm:$0xff]  }
  0x69   :  { %506 = vmatpush1.bf16.msra.mxu1 %v1472_v17  ;;  %v1526_v17 = vld [vmem:[#allocation5 + $0x12c] ss:$16 sps:$4 sm:$0xff]   ;;  %v1589_v33 = vld [vmem:[#allocation7 + $0xe0] ss:$8 sps:$4 sm:$0xff]   ;;  %v1592_v35 = vld [vmem:[#allocation7 + $0xf0] ss:$8 sps:$4 sm:$0xff]  }
  0x6a   :  { %507 = vmatprep.subr.bf16.mxu1 %v1473_v18  ;;  %986 = vmatpush1.bf16.msra.mxu0 %v1559_v44  ;;  %v1586_v18 = vld [vmem:[#allocation7 + $0xd0] ss:$8 sps:$4 sm:$0xff]   ;;  %v1643_v39 = vld [vmem:[#allocation8 + $0x48] sm:$0xff]  }
  0x6b   :  { %987 = vmatprep.subr.bf16.mxu0 %v1560_v46  ;;  %v1647_v43 = vld [vmem:[#allocation8 + $0x58] sm:$0xff]   ;;  %v1650_v46 = vld [vmem:[#allocation8 + $0x20] sm:$0xff]  }
  0x6c   :  { %v1648_v44 = vld [vmem:[#allocation8 + $0x18] sm:$0xff]  }
  0x6d   :  { %508 = vmatpush1.bf16.msra.mxu1 %v1475_v19  ;;  %v1524_v19 = vld [vmem:[#allocation5 + $0x128] ss:$16 sps:$4 sm:$0xff]  }
  0x6e   :  { %509 = vmatprep.subr.bf16.mxu1 %v1476_v20  ;;  %988 = vmatpush1.bf16.msra.mxu0 %v1562_v50  ;;  %v1529_v20 = vld [vmem:[#allocation5 + $0x14c] ss:$16 sps:$4 sm:$0xff]  }
  0x6f   :  { %989 = vmatprep.subr.bf16.mxu0 %v1563_v51 }
  0x71   :  { %510 = vmatpush1.bf16.msra.mxu1 %v1478_v21  ;;  %v1527_v21 = vld [vmem:[#allocation5 + $0x148] ss:$16 sps:$4 sm:$0xff]  }
  0x72   :  { %511 = vmatprep.subr.bf16.mxu1 %v1479_v22  ;;  %990 = vmatpush1.bf16.msra.mxu0 %v1565_v54  ;;  %v1532_v22 = vld [vmem:[#allocation5 + $0x16c] ss:$16 sps:$4 sm:$0xff]  }
  0x73   :  { %991 = vmatprep.subr.bf16.mxu0 %v1566_v55 }
  0x75   :  { %512 = vmatpush1.bf16.msra.mxu1 %v1481_v23  ;;  %v1530_v23 = vld [vmem:[#allocation5 + $0x168] ss:$16 sps:$4 sm:$0xff]  }
  0x76   :  { %513 = vmatprep.subr.bf16.mxu1 %v1482_v24  ;;  %992 = vmatpush1.bf16.msra.mxu0 %v1568_v58  ;;  %v1535_v24 = vld [vmem:[#allocation5 + $0x18c] ss:$16 sps:$4 sm:$0xff]  }
  0x77   :  { %993 = vmatprep.subr.bf16.mxu0 %v1569_v59 }
  0x79   :  { %514 = vmatpush1.bf16.msra.mxu1 %v1484_v25  ;;  %v1533_v25 = vld [vmem:[#allocation5 + $0x188] ss:$16 sps:$4 sm:$0xff]  }
  0x7a   :  { %515 = vmatprep.subr.bf16.mxu1 %v1485_v26  ;;  %994 = vmatpush1.bf16.msra.mxu0 %v1571_v62  ;;  %v1538_v26 = vld [vmem:[#allocation5 + $0x1ac] ss:$16 sps:$4 sm:$0xff]  }
  0x7b   :  { %995 = vmatprep.subr.bf16.mxu0 %v1572_v63 }
  0x7d   :  { %516 = vmatpush1.bf16.msra.mxu1 %v1487_v30  ;;  %v1544_v30 = vld [vmem:[#allocation5 + $0x1ec] ss:$16 sps:$4 sm:$0xff]  }
  0x7e   :  { %517 = vmatprep.subr.bf16.mxu1 %v1488_v32  ;;  %996 = vmatpush1.bf16.msra.mxu0 %v1574_v2  ;;  %v1587_v32 = vld [vmem:[#allocation7 + $0xe4] ss:$8 sps:$4 sm:$0xff]   ;;  %v1593_v2 = vld [vmem:[#allocation7 + $0x100] ss:$8 sps:$4 sm:$0xff]  }
  0x7f   :  { %997 = vmatprep.subr.bf16.mxu0 %v1575_v3  ;;  %v1598_v3 = vld [vmem:[#allocation7 + $0x114] ss:$8 sps:$4 sm:$0xff]  }
  0x81   :  { %518 = vmatpush1.bf16.msra.mxu1 %v1490_v34  ;;  %v1590_v34 = vld [vmem:[#allocation7 + $0xf4] ss:$8 sps:$4 sm:$0xff]  }
  0x82   :  { %519 = vmatprep.subr.bf16.mxu1 %v1491_v36  ;;  %998 = vmatpush1.bf16.msra.mxu0 %v1577_v6  ;;  %v1595_v36 = vld [vmem:[#allocation7 + $0x104] ss:$8 sps:$4 sm:$0xff]   ;;  %v1599_v6 = vld [vmem:[#allocation7 + $0x120] ss:$8 sps:$4 sm:$0xff]  }
  0x83   :  { %999 = vmatprep.subr.bf16.mxu0 %v1578_v7  ;;  %v1604_v7 = vld [vmem:[#allocation7 + $0x134] ss:$8 sps:$4 sm:$0xff]  }
  0x85   :  { %520 = vmatpush1.bf16.msra.mxu1 %v1493_v38  ;;  %v1642_v38 = vld [vmem:[#allocation8] sm:$0xff]  }
  0x86   :  { %521 = vmatprep.subr.bf16.mxu1 %v1494_v40  ;;  %1000 = vmatpush1.bf16.msra.mxu0 %v1580_v10  ;;  %v1644_v40 = vld [vmem:[#allocation8 + $0x8] sm:$0xff]  }
  0x87   :  { %1001 = vmatprep.subr.bf16.mxu0 %v1581_v11  ;;  %v1605_v10 = vld [vmem:[#allocation7 + $0x140] ss:$8 sps:$4 sm:$0xff]   ;;  %v1610_v11 = vld [vmem:[#allocation7 + $0x154] ss:$8 sps:$4 sm:$0xff]  }
  0x89   :  { %522 = vmatpush1.bf16.msra.mxu1 %v1496_v42  ;;  %v1646_v42 = vld [vmem:[#allocation8 + $0x10] sm:$0xff]  }
  0x8a   :  { %532 = vmatprep.subr.bf16.mxu1 %v1499_v45  ;;  %v1649_v45 = vld [vmem:[#allocation8 + $0x60] sm:$0xff]  }
  0x8c   :  { %524 = vmatmul.mubr.bf16.vlgmr.msra.gmra.mrb[0].mxu1 %v1881_v48 }
  0x8d   :  { %533 = vmatpush1.bf16.msra.mxu1 %v1497_v47  ;;  %564 = vmatprep.mubr.bf16.mxu1 %v1878_v14  ;;  %v1583_v14 = vld [vmem:[#allocation7 + $0xc0] ss:$8 sps:$4 sm:$0xff]  }
  0x8e   :  { %534 = vmatprep.subr.bf16.mxu1 %v1502_v49  ;;  %1002 = vmatpush1.bf16.msra.mxu0 %v1583_v14  ;;  %v1651_v47 = vld [vmem:[#allocation8 + $0x68] sm:$0xff]   ;;  %v151_v49 = vlaneseq }
  0x8f   :  { %1003 = vmatprep.subr.bf16.mxu0 %v1584_v15  ;;  %v1611_v14 = vld [vmem:[#allocation7 + $0x160] ss:$8 sps:$4 sm:$0xff]   ;;  %v1616_v15 = vld [vmem:[#allocation7 + $0x174] ss:$8 sps:$4 sm:$0xff]  }
  0x90   :  { %v1886_v50 = vshrl.u32 %v151_v49, 7  ;;  %v1655_v49 = vld [vmem:[#allocation8 + $0x78] sm:$0xff]  }
  0x91   :  { %535 = vmatpush1.bf16.msra.mxu1 %v1500_v52  ;;  %v1892_v52 = vld [vmem:[%s1929_s2] sm:$0xf] }
  0x92   :  { %536 = vmatprep.subr.bf16.mxu1 %v1505_v53  ;;  %1004 = vmatpush1.bf16.msra.mxu0 %v1586_v18  ;;  %v153_v51 = vsub.s32 0, %v1886_v50  ;;  %v157_v53 = vsub.s32 1, %v1886_v50  ;;  %v1617_v18 = vld [vmem:[#allocation7 + $0x180] ss:$8 sps:$4 sm:$0xff]  }
  0x93   :  { %1005 = vmatprep.subr.bf16.mxu0 %v1587_v32 }
  0x94   :  { %v154_v54 = vrot.slane %v1892_v52, %v153_v51  ;;  %v158_v55 = vrot.slane %v1892_v52, %v157_v53 }
  0x95   :  { %537 = vmatpush1.bf16.msra.mxu1 %v1503_v56 }
  0x96   :  { %538 = vmatprep.subr.bf16.mxu1 %v1508_v57  ;;  %1006 = vmatpush1.bf16.msra.mxu0 %v1589_v33 }
  0x97   :  { %1007 = vmatprep.subr.bf16.mxu0 %v1590_v34  ;;  %v1635_v34 = vld [vmem:[#allocation7 + $0x1e0] ss:$8 sps:$4 sm:$0xff]  }
  0x99   :  { %539 = vmatpush1.bf16.msra.mxu1 %v1506_v60 }
  0x9a   :  { %540 = vmatprep.subr.bf16.mxu1 %v1511_v61  ;;  %1008 = vmatpush1.bf16.msra.mxu0 %v1592_v35  ;;  %v1640_v35 = vld [vmem:[#allocation7 + $0x1f4] ss:$8 sps:$4 sm:$0xff]  }
  0x9b   :  { %1018 = vmatprep.subr.bf16.mxu0 %v1595_v36 }
  0x9d   :  { %541 = vmatpush1.bf16.msra.mxu1 %v1509_v0 }
  0x9e   :  { %542 = vmatprep.subr.bf16.mxu1 %v1514_v1 }
  0xa1   :  { %543 = vmatpush1.bf16.msra.mxu1 %v1512_v4  ;;  %v1596_v4 = vld [vmem:[#allocation7 + $0x110] ss:$8 sps:$4 sm:$0xff]  }
  0xa2   :  { %544 = vmatprep.subr.bf16.mxu1 %v1517_v5  ;;  %v1601_v5 = vld [vmem:[#allocation7 + $0x124] ss:$8 sps:$4 sm:$0xff]  }
  0xa5   :  { %545 = vmatpush1.bf16.msra.mxu1 %v1515_v8  ;;  %v1602_v8 = vld [vmem:[#allocation7 + $0x130] ss:$8 sps:$4 sm:$0xff]  }
  0xa6   :  { %546 = vmatprep.subr.bf16.mxu1 %v1520_v9  ;;  %v1607_v9 = vld [vmem:[#allocation7 + $0x144] ss:$8 sps:$4 sm:$0xff]  }
  0xa9   :  { %547 = vmatpush1.bf16.msra.mxu1 %v1518_v12  ;;  %v1608_v12 = vld [vmem:[#allocation7 + $0x150] ss:$8 sps:$4 sm:$0xff]  }
  0xaa   :  { %548 = vmatprep.subr.bf16.mxu1 %v1523_v13  ;;  %v1613_v13 = vld [vmem:[#allocation7 + $0x164] ss:$8 sps:$4 sm:$0xff]  }
  0xad   :  { %549 = vmatpush1.bf16.msra.mxu1 %v1521_v16  ;;  %v1614_v16 = vld [vmem:[#allocation7 + $0x170] ss:$8 sps:$4 sm:$0xff]  }
  0xae   :  { %550 = vmatprep.subr.bf16.mxu1 %v1526_v17  ;;  %v1619_v17 = vld [vmem:[#allocation7 + $0x184] ss:$8 sps:$4 sm:$0xff]  }
  0xb1   :  { %551 = vmatpush1.bf16.msra.mxu1 %v1524_v19  ;;  %v1622_v19 = vld [vmem:[#allocation7 + $0x194] ss:$8 sps:$4 sm:$0xff]  }
  0xb2   :  { %552 = vmatprep.subr.bf16.mxu1 %v1529_v20  ;;  %v1620_v20 = vld [vmem:[#allocation7 + $0x190] ss:$8 sps:$4 sm:$0xff]  }
  0xb5   :  { %553 = vmatpush1.bf16.msra.mxu1 %v1527_v21  ;;  %v1625_v21 = vld [vmem:[#allocation7 + $0x1a4] ss:$8 sps:$4 sm:$0xff]  }
  0xb6   :  { %554 = vmatprep.subr.bf16.mxu1 %v1532_v22  ;;  %v1623_v22 = vld [vmem:[#allocation7 + $0x1a0] ss:$8 sps:$4 sm:$0xff]  }
  0xb9   :  { %555 = vmatpush1.bf16.msra.mxu1 %v1530_v23  ;;  %v1628_v23 = vld [vmem:[#allocation7 + $0x1b4] ss:$8 sps:$4 sm:$0xff]  }
  0xba   :  { %556 = vmatprep.subr.bf16.mxu1 %v1535_v24  ;;  %v1626_v24 = vld [vmem:[#allocation7 + $0x1b0] ss:$8 sps:$4 sm:$0xff]  }
  0xbd   :  { %557 = vmatpush1.bf16.msra.mxu1 %v1533_v25  ;;  %v1631_v25 = vld [vmem:[#allocation7 + $0x1c4] ss:$8 sps:$4 sm:$0xff]  }
  0xbe   :  { %558 = vmatprep.subr.bf16.mxu1 %v1538_v26  ;;  %v1629_v26 = vld [vmem:[#allocation7 + $0x1c0] ss:$8 sps:$4 sm:$0xff]  }
  0xc1   :  { %559 = vmatpush1.bf16.msra.mxu1 %v1536_v27  ;;  %v1634_v27 = vld [vmem:[#allocation7 + $0x1d4] ss:$8 sps:$4 sm:$0xff]  }
  0xc2   :  { %560 = vmatprep.subr.bf16.mxu1 %v1541_v28  ;;  %v161_v28 = vsub.s32 2, %v1886_v50 }
  0xc4   :  { %v162_v32 = vrot.slane %v1892_v52, %v161_v28 }
  0xc5   :  { %561 = vmatpush1.bf16.msra.mxu1 %v1539_v29  ;;  %v1632_v29 = vld [vmem:[#allocation7 + $0x1d0] ss:$8 sps:$4 sm:$0xff]  }
  0xc6   :  { %562 = vmatprep.subr.bf16.mxu1 %v1544_v30  ;;  %v165_v30 = vsub.s32 3, %v1886_v50 }
  0xc8   :  { %v166_v33 = vrot.slane %v1892_v52, %v165_v30  ;;  %v1656_v52 = vld [vmem:[#allocation8 + $0x38] sm:$0xff]  }
  0xc9   :  { %563 = vmatpush1.bf16.msra.mxu1 %v1542_v31  ;;  %v1637_v31 = vld [vmem:[#allocation7 + $0x1e4] ss:$8 sps:$4 sm:$0xff]  }
  0xca   :  { %1410 = vmatprep.subr.bf16.mxu1 %v1641_v37 }
  0xcc   :  { %565 = vmatmul.mubr.bf16.vlgmr.msra.gmra.mrb[4].mxu1 %v1881_v48  ;;  %v1652_v48 = vld [vmem:[#allocation8 + $0x28] sm:$0xff]  }
  0xcd   :  { %1411 = vmatpush3.bf16.msra.mxu1 %v1642_v38 }
  0xce   :  { %1412 = vmatprep.subr.bf16.mxu1 %v1643_v39 }
  0xd1   :  { %1413 = vmatpush3.bf16.msra.mxu1 %v1644_v40 }
  0xd2   :  { %1414 = vmatprep.subr.bf16.mxu1 %v1645_v41  ;;  %v1638_v41 = vld [vmem:[#allocation7 + $0x1f0] ss:$8 sps:$4 sm:$0xff]  }
  0xd5   :  { %1415 = vmatpush3.bf16.msra.mxu1 %v1646_v42 }
  0xd6   :  { %1416 = vmatprep.subr.bf16.mxu1 %v1647_v43 }
  0xd9   :  { %1417 = vmatpush3.bf16.msra.mxu1 %v1648_v44 }
  0xda   :  { %1418 = vmatprep.subr.bf16.mxu1 %v1649_v45 }
  0xdd   :  { %1419 = vmatpush3.bf16.msra.mxu1 %v1650_v46 }
  0xde   :  { %1420 = vmatprep.subr.bf16.mxu1 %v1651_v47  ;;  %v1653_v47 = vld [vmem:[#allocation8 + $0x70] sm:$0xff]  }
  0xe1   :  { %1421 = vmatpush3.bf16.msra.mxu1 %v1652_v48  ;;  %v1654_v48 = vld [vmem:[#allocation8 + $0x30] sm:$0xff]  }
  0xe2   :  { %1422 = vmatprep.subr.bf16.mxu1 %v1653_v47 }
  0xe5   :  { %1423 = vmatpush3.bf16.msra.mxu1 %v1654_v48 }
  0xe6   :  { %1424 = vmatprep.subr.bf16.mxu1 %v1655_v49 }
  0xe9   :  { %1425 = vmatpush3.bf16.msra.mxu1 %v1656_v52 }
 0x15f   :  { %v525_v56 = vpop.f32.mrb[0].mxu1 }
 0x160   :  { %v526_v57 = vadd.f32 %v525_v56, %v154_v54  ;;  %v527_v58 = vpop.f32.mrb[1].mxu1  ;;  %v645_v54 = vld [vmem:[%s1931_s4] sm:$0x3] }
 0x161   :  { %v528_v59 = vadd.f32 %v527_v58, %v158_v55  ;;  %v529_v60 = vpop.f32.mrb[2].mxu1  ;;  %v650_v55 = vrot.slane %v645_v54, %v153_v51  ;;  %v654_v56 = vrot.slane %v645_v54, %v157_v53  ;;  %v1393_v51 = vld [vmem:[%s1933_s6] ss:$0 sm:$0xff]  ;;  %s1749_s6 = scalar_lea.vmem %s1255_s9, 128 }
 0x162   :  { %v573_v61 = vmax.f32 %v526_v57, 0.0  ;;  %v530_v62 = vpop.f32.mrb[3].mxu1  ;;  %p1750_p4 = scmp.ne.s32.totalorder %s1255_s9, %s1749_s6  ;;  %p1755_p6 = scmp.lt.s32.totalorder %s1749_s6, %s1749_s6 }
 0x163   :  { %v574_v63 = vmax.f32 %v528_v59, 0.0 }
 0x164   :  { %v577_v0 = vpack.c.bf16 %v573_v61, %v573_v61  ;;  %p1756_p7 = por %p1755_p6, %p1754_p5 }
 0x165   :  { %v578_v1 = vpack.c.bf16 %v574_v63, %v574_v63 }
 0x166   :  { %p1757_p8 = pnand %p1756_p7, %p1750_p4 }
 0x167   :  { %1009 = vmatprep.mubr.bf16.mxu0 %v578_v1 }
 0x168   :  { %1010 = vmatmul.mubr.bf16.vlgmr.msra.gmra.mrb[0].mxu0 %v577_v0 }
 0x169   :  { %1019 = vmatpush1.bf16.msra.mxu0 %v1593_v2 }
 0x16a   :  { %1020 = vmatprep.subr.bf16.mxu0 %v1598_v3 }
 0x16d   :  { %1021 = vmatpush1.bf16.msra.mxu0 %v1596_v4 }
 0x16e   :  { %1022 = vmatprep.subr.bf16.mxu0 %v1601_v5 }
 0x171   :  { %1023 = vmatpush1.bf16.msra.mxu0 %v1599_v6 }
 0x172   :  { %1024 = vmatprep.subr.bf16.mxu0 %v1604_v7 }
 0x175   :  { %1025 = vmatpush1.bf16.msra.mxu0 %v1602_v8 }
 0x176   :  { %1026 = vmatprep.subr.bf16.mxu0 %v1607_v9 }
 0x179   :  { %1027 = vmatpush1.bf16.msra.mxu0 %v1605_v10 }
 0x17a   :  { %1028 = vmatprep.subr.bf16.mxu0 %v1610_v11 }
 0x17d   :  { %1029 = vmatpush1.bf16.msra.mxu0 %v1608_v12 }
 0x17e   :  { %1030 = vmatprep.subr.bf16.mxu0 %v1613_v13 }
 0x181   :  { %1031 = vmatpush1.bf16.msra.mxu0 %v1611_v14 }
 0x182   :  { %1032 = vmatprep.subr.bf16.mxu0 %v1616_v15 }
 0x185   :  { %1033 = vmatpush1.bf16.msra.mxu0 %v1614_v16 }
 0x186   :  { %1034 = vmatprep.subr.bf16.mxu0 %v1619_v17 }
 0x189   :  { %1035 = vmatpush1.bf16.msra.mxu0 %v1617_v18 }
 0x18a   :  { %1036 = vmatprep.subr.bf16.mxu0 %v1622_v19 }
 0x18d   :  { %1037 = vmatpush1.bf16.msra.mxu0 %v1620_v20 }
 0x18e   :  { %1038 = vmatprep.subr.bf16.mxu0 %v1625_v21 }
 0x191   :  { %1039 = vmatpush1.bf16.msra.mxu0 %v1623_v22 }
 0x192   :  { %1040 = vmatprep.subr.bf16.mxu0 %v1628_v23 }
 0x195   :  { %1041 = vmatpush1.bf16.msra.mxu0 %v1626_v24 }
 0x196   :  { %1042 = vmatprep.subr.bf16.mxu0 %v1631_v25 }
 0x199   :  { %1043 = vmatpush1.bf16.msra.mxu0 %v1629_v26 }
 0x19a   :  { %1044 = vmatprep.subr.bf16.mxu0 %v1634_v27 }
 0x19d   :  { %1045 = vmatpush1.bf16.msra.mxu0 %v1632_v29 }
 0x19e   :  { %1046 = vmatprep.subr.bf16.mxu0 %v1637_v31 }
 0x19f   :  { %v566_v36 = vpop.f32.mrb[4].mxu1 }
 0x1a0   :  { %v567_v37 = vadd.f32 %v566_v36, %v162_v32  ;;  %v568_v38 = vpop.f32.mrb[5].mxu1 }
 0x1a1   :  { %v569_v39 = vadd.f32 %v568_v38, %v166_v33  ;;  %v570_v40 = vpop.f32.mrb[6].mxu1  ;;  %1047 = vmatpush1.bf16.msra.mxu0 %v1635_v34 }
 0x1a2   :  { %v575_v42 = vmax.f32 %v567_v37, 0.0  ;;  %v571_v43 = vpop.f32.mrb[7].mxu1  ;;  %1048 = vmatprep.subr.bf16.mxu0 %v1640_v35 }
 0x1a3   :  { %v576_v44 = vmax.f32 %v569_v39, 0.0 }
 0x1a4   :  { %v579_v46 = vpack.c.bf16 %v575_v42, %v575_v42 }
 0x1a5   :  { %v580_v45 = vpack.c.bf16 %v576_v44, %v576_v44  ;;  %1049 = vmatpush1.bf16.msra.mxu0 %v1638_v41 }
 0x1a7   :  { %1050 = vmatprep.mubr.bf16.mxu0 %v580_v45 }
 0x1a8   :  { %1051 = vmatmul.mubr.bf16.vlgmr.msra.gmra.mrb[0].mxu0 %v579_v46 }
 0x27b   :  { %v1052_v57 = vpop.f32.mrb[0].mxu0 }
 0x27c   :  { %v1432_v58 = vadd.f32 %v1052_v57, %v650_v55  ;;  %v1054_v59 = vpop.f32.mrb[1].mxu0 }
 0x27d   :  { %v1433_v60 = vadd.f32 %v1054_v59, %v654_v56  ;;  %v1056_v61 = vpop.f32.mrb[2].mxu0 }
 0x27e   :  { %v1059_v62 = vmax.f32 %v1432_v58, 0.0  ;;  %v1057_v63 = vpop.f32.mrb[3].mxu0 }
 0x27f   :  { %v1060_v0 = vmax.f32 %v1433_v60, 0.0 }
 0x280   :  { %v1061_v2 = vpack.c.bf16 %v1059_v62, %v1059_v62 }
 0x281   :  { %v1062_v1 = vpack.c.bf16 %v1060_v0, %v1060_v0 }
 0x283   :  { %1230 = vmatprep.mubr.bf16.mxu1 %v1062_v1 }
 0x284   :  { %1231 = vmatmul.mubr.bf16.vlgmr.msra.gmra.mrb[8].mxu1 %v1061_v2 }
 0x357   :  { %v1426_v3 = vpop.f32.mrb[8].mxu1 }
 0x358   :  { %v1427_v4 = vpop.f32.mrb[9].mxu1 }
 0x359   :  { %v1428_v50 = vadd.f32 %v1427_v4, %v1426_v3  ;;  %v1429_v53 = vpop.f32.mrb[10].mxu1 }
 0x35a   :  { %v1430_v5 = vpop.f32.mrb[11].mxu1 }
 0x35b   :  { %v1233_v6 = vadd.f32 %v1428_v50, %v1393_v51 }
 0x35d   :  { %1238 = vmax.xlane.f32.xlu0 %v1233_v6 }
 0x3ea   :  { %v1239_v7 = vpop.xlane.xlu0 %1238 }
 0x3eb   :  { %v1240_v8 = vsub.f32 %v1233_v6, %v1239_v7 }
 0x3ed   :  { %v1241_v9 = vmul.f32 1.442695, %v1240_v8 }
 0x3ef   :  { %1657 = vpow2.f32 %v1241_v9 }
 0x3f9   :  { %v1658_v10 = vpop.eup %1657 }
 0x3fa   :  { %1243 = vadd.xlane.f32.xlu0 %v1658_v10 }
 0x487   :  { %v1244_v11 = vpop.xlane.xlu0 %1243 }
 0x488   :  { %1659 = vrcp.f32 %v1244_v11 }
 0x492   :  { %v1660_v12 = vpop.eup %1659 }
 0x493   :  { %v1246_v13 = vmul.f32 %v1660_v12, %v1658_v10 }
 0x495   :  { %1247 = vst [vmem:[#allocation10] sm:$0xff] %v1246_v13 }
 0x496   :  { %1760 = shalt.err (!%p1757_p8)
}
 0x497   :  { %s1761_s12 = scalar_lea.hbm %s1934_s7, 128 }
 0x498   :  { %p1762_p9 = scmp.ne.s32.totalorder %s1934_s7, %s1761_s12  ;;  %p1765_p10 = scmp.lt.u32.totalorder %s1761_s12, %s1934_s7 }
 0x49a   :  { %p1767_p11 = pnand %p1765_p10, %p1762_p9 }
 0x49c   :  { %1770 = shalt.err (!%p1767_p11)
}
 0x49d   :  { %1257 = dma.vmem_to_hbm [thread:$0]  %s1255_s9, 128, %s1934_s7, [#allocation4]  }
 0x49e   :  { %1777 = dma.done.wait [#allocation4], 128  }
 0x49f   :  { %1778 = vsyncadd [#allocation4], 4294967168 }
 0x4a0   :  { %1261 = vsyncpa [#allocation3], 1 }
 0x4a1   :  { %1262 = vsyncpa [#allocation6], 1 }
 0x4a2   :  { %1263 = vsyncpa [#allocation9], 1 }
 0x4a3   :  { %1264 = vsyncpa [#allocation4], 1 }

</bundles_post_ra>
